<compile_context>
chip_gen: v7x
topology: tpu7x:2x2x1
jax: 0.10.0
libtpu: 0.0.40
codegen_flags: <defaults>
</compile_context>

<pallas_src>
import functools

import jax
import jax.numpy as jnp
from jax.experimental import pallas as pl
from jax.experimental.pallas import tpu as pltpu


def _round_up(n, m):
    return ((n + m - 1) // m) * m


def _device_kind():
    try:
        return jax.devices()[0].device_kind.lower()
    except Exception:
        return ""


def _activation_dtype(kind):
    # bf16 VPU/EUP exists on v6e / v7x; keep f32 elementwise math elsewhere.
    return jnp.bfloat16 if ("v6" in kind or "v7" in kind) else jnp.float32


def wnn_kernel(x_ref, w1_ref, sb_ref, w2_ref, b2_ref, o_ref, *, act_dtype):
    # First linear (bias-free, as in WaveletNeuronLayer):
    # wx = x @ W1^T  (bf16 operands, f32 accumulation on the MXU).
    wx = jnp.dot(x_ref[...], w1_ref[...], preferred_element_type=jnp.float32)
    # z = (wx - b1) / scale rewritten as a fused mul-sub with precomputed
    # reciprocals: z = wx * (1/scale) - b1 * (1/scale).  Kept in f32 (z feeds
    # exp(-z^2/2), the precision-sensitive part of the wavelet).
    z = wx * sb_ref[0:1, :] - sb_ref[1:2, :]
    # Mexican-hat wavelet: (1 - z^2) * exp(-z^2/2).  Runs in bf16 on v6e/v7x
    # (halves the saturating VALU/EUP cycles), f32 on v5e.
    zb = z.astype(act_dtype)
    z2 = zb * zb
    h = (1.0 - z2) * jnp.exp(-0.5 * z2)
    # Output linear: h @ W2^T + b2 (bf16 operands, f32 accumulation).
    out = jnp.dot(h.astype(w2_ref.dtype), w2_ref[...],
                  preferred_element_type=jnp.float32) + b2_ref[...]
    o_ref[...] = out.astype(o_ref.dtype)


def prepare_wnn_params(w1, b1, scale, w2, b2):
    """One-time weight prep (pad / transpose / cast / fold 1/scale).

    Cache the returned arrays across forward calls; wavelet_nn_forward then
    only touches x per call.
    """
    H, D = w1.shape
    O, H2 = w2.shape
    assert H2 == H
    LANE = 128
    H_pad = _round_up(H, LANE)
    O_pad = _round_up(O, LANE)
    f32, bf16 = jnp.float32, jnp.bfloat16

    w1_t = jnp.zeros((D, H_pad), bf16).at[:, :H].set(
        jnp.asarray(w1, f32).T.astype(bf16))
    # NOTE: assumes scale entries are nonzero (the module initializes scale to
    # ones); a zero scale would give inf here, matching PyTorch's divide.
    inv_s = 1.0 / jnp.asarray(scale, f32)
    sb = (jnp.zeros((2, H_pad), f32)
          .at[0, :H].set(inv_s)
          .at[1, :H].set(jnp.asarray(b1, f32) * inv_s))
    # Padded H rows of w2_t are zero -> padded wavelet neurons (h == 1) do not
    # contribute to the output.  Padded O columns are zero and sliced off.
    w2_t = jnp.zeros((H_pad, O_pad), bf16).at[:H, :O].set(
        jnp.asarray(w2, f32).T.astype(bf16))
    b2_p = jnp.zeros((1, O_pad), f32).at[0, :O].set(jnp.asarray(b2, f32))
    return w1_t, sb, w2_t, b2_p


@functools.partial(jax.jit, static_argnames=("out_dim", "block_b"))
def wavelet_nn_forward(x, w1_t, sb, w2_t, b2_p, *, out_dim, block_b=512):
    """
    x:     (B, D)       input (any float dtype)
    w1_t:  (D, H_pad)   bf16, from prepare_wnn_params
    sb:    (2, H_pad)   f32  [1/scale ; b1/scale]
    w2_t:  (H_pad, O_pad) bf16
    b2_p:  (1, O_pad)   f32
    returns (B, out_dim) float32
    """
    B, D = x.shape
    H_pad = w1_t.shape[1]
    O_pad = w2_t.shape[1]

    kind = _device_kind()
    act_dtype = _activation_dtype(kind)
    is_v7 = "v7" in kind
    num_tc = 2 if is_v7 else 1            # v7x: 2 TensorCores per chip

    # ---- VMEM budgeting (generation-aware) --------------------------------
    # Constant weight operands are single-buffered; x / out tiles keep the
    # default double buffering.
    w_bytes = w1_t.size * 2 + sb.size * 4 + w2_t.size * 2 + b2_p.size * 4
    row_bytes = 2 * (D * 2) + 2 * (O_pad * 4)      # double-buffered x + out
    budget = (40 << 20) if is_v7 else (80 << 20)
    # TODO(synk): if the resident weights alone exceed the budget (very large
    # D or H), add a K-reduction grid axis with an f32 scratch accumulator
    # instead of shrinking the batch tile.
    tb_cap = max(8, (max(budget - w_bytes, row_bytes * 8) // row_bytes) // 8 * 8)
    eff_block_b = min(block_b, tb_cap, 256 if is_v7 else 1024)

    # ---- balanced batch tiling ---------------------------------------------
    n_tiles = pl.cdiv(B, eff_block_b)
    if num_tc > 1 and n_tiles < num_tc and B >= 8 * num_tc:
        n_tiles = num_tc                            # keep both v7x cores busy
    TB = _round_up(pl.cdiv(B, n_tiles), 8)
    n_tiles = pl.cdiv(B, TB)
    B_pad = n_tiles * TB

    # Per-call input prep: only a bf16 cast; pad only when actually needed.
    if B_pad == B:
        x_p = x.astype(jnp.bfloat16)
    else:
        x_p = jnp.zeros((B_pad, D), jnp.bfloat16).at[:B, :].set(
            x.astype(jnp.bfloat16))

    est_vmem = w_bytes + TB * row_bytes
    vmem_limit = int(min((56 << 20) if is_v7 else (100 << 20),
                         max(32 << 20, 2 * est_vmem)))

    cost = pl.CostEstimate(
        flops=2 * B_pad * (D * H_pad + H_pad * O_pad),
        transcendentals=B_pad * H_pad,
        bytes_accessed=(B_pad * D * 2 + w_bytes + B_pad * O_pad * 4),
    )

    batch = lambda i: (i, 0)          # activations walk the batch axis
    const = lambda i: (0, 0)          # weights / bias stay VMEM-resident

    def const_spec(shape):
        # Constant index_map across the grid -> single buffer is enough.
        return pl.BlockSpec(shape, const, pipeline_mode=pl.Buffered(1))

    out = pl.pallas_call(
        functools.partial(wnn_kernel, act_dtype=act_dtype),
        out_shape=jax.ShapeDtypeStruct((B_pad, O_pad), jnp.float32),
        grid=(n_tiles,),
        in_specs=[
            pl.BlockSpec((TB, D), batch),       # x tile (double-buffered)
            const_spec((D, H_pad)),             # W1^T
            const_spec((2, H_pad)),             # [1/scale ; b1/scale]
            const_spec((H_pad, O_pad)),         # W2^T
            const_spec((1, O_pad)),             # b2
        ],
        out_specs=pl.BlockSpec((TB, O_pad), batch),
        compiler_params=pltpu.CompilerParams(
            dimension_semantics=("parallel",),
            vmem_limit_bytes=vmem_limit,
        ),
        cost_estimate=cost,
    )(x_p, w1_t, sb, w2_t, b2_p)

    return out[:B, :out_dim]


def reference_forward_f32(x, w1, b1, scale, w2, b2):
    """Exact f32 reference matching the PyTorch module."""
    wx = x @ w1.T
    z = (wx - b1) / scale
    h = (1.0 - z ** 2) * jnp.exp(-(z ** 2) / 2.0)
    return h @ w2.T + b2


def reference_forward_matched(x, w1, b1, scale, w2, b2, act_dtype):
    """Precision-matched reference (bf16 MXU operands, f32 accum, act_dtype
    elementwise activation)."""
    wx = jnp.dot(x.astype(jnp.bfloat16), w1.T.astype(jnp.bfloat16),
                 preferred_element_type=jnp.float32)
    inv_s = 1.0 / scale
    z = wx * inv_s - b1 * inv_s
    zb = z.astype(act_dtype)
    z2 = zb * zb
    h = (1.0 - z2) * jnp.exp(-0.5 * z2)
    return jnp.dot(h.astype(jnp.bfloat16), w2.T.astype(jnp.bfloat16),
                   preferred_element_type=jnp.float32) + b2


if __name__ == "__main__":
    key = jax.random.PRNGKey(0)
    k_x, k_w1, k_b1, k_w2, k_b2 = jax.random.split(key, 5)

    B, D, H, O = 8, 32, 64, 16  # batch, input_dim, num_wavelet_neurons, output_dim

    x = jax.random.normal(k_x, (B, D), jnp.float32)
    # WaveletNeuronLayer params: randn weights, randn bias, ones scale
    w1 = jax.random.normal(k_w1, (H, D), jnp.float32)
    b1 = jax.random.normal(k_b1, (H,), jnp.float32)
    scale = jnp.ones((H,), jnp.float32)
    # nn.Linear(H, O) params (deterministic synthetic init)
    w2 = jax.random.normal(k_w2, (O, H), jnp.float32) * 0.1
    b2 = jax.random.normal(k_b2, (O,), jnp.float32) * 0.1

    # One-time weight prep (cache these across forward calls).
    w1_t, sb, w2_t, b2_p = prepare_wnn_params(w1, b1, scale, w2, b2)

    out = jax.block_until_ready(
        wavelet_nn_forward(x, w1_t, sb, w2_t, b2_p, out_dim=O))
    assert out.shape == (B, O)

    # Precision-matched check (same bf16 MXU / activation dtype path).
    act_dtype = _activation_dtype(_device_kind())
    ref_m = reference_forward_matched(x, w1, b1, scale, w2, b2, act_dtype)
    assert jnp.allclose(out, ref_m, atol=3e-2, rtol=3e-2), \
        "mismatch vs matched reference"

    # Loose check against the exact f32 PyTorch-equivalent reference
    # (tolerance relaxed because MXU operands are bf16).
    ref = reference_forward_f32(x, w1, b1, scale, w2, b2)
    assert jnp.allclose(out, ref, atol=1e-1, rtol=1e-1), \
        "mismatch vs f32 reference"

    print("KERNEL_OK")
</pallas_src>

<mosaic_0001>
module attributes {stable_mosaic.version = 11 : i64} {
  func.func @wnn_kernel(%arg0: i32, %arg1: memref<8x32xbf16, #tpu.memory_space<vmem>>, %arg2: memref<32x128xbf16, #tpu.memory_space<vmem>>, %arg3: memref<2x128xf32, #tpu.memory_space<vmem>>, %arg4: memref<128x128xbf16, #tpu.memory_space<vmem>>, %arg5: memref<1x128xf32, #tpu.memory_space<vmem>>, %arg6: memref<8x128xf32, #tpu.memory_space<vmem>>) attributes {dimension_semantics = [#tpu.dimension_semantics<parallel>], iteration_bounds = array<i64: 1>, scalar_prefetch = 0 : i64, scratch_operands = 0 : i64, tpu.core_type = #tpu.core_type<tc>, window_params = [{transform_indices = @transform_0, window_bounds = array<i64: 8, 32>}, {pipeline_mode = #tpu.pipeline_mode<synchronous>, transform_indices = @transform_1, window_bounds = array<i64: 32, 128>}, {pipeline_mode = #tpu.pipeline_mode<synchronous>, transform_indices = @transform_2, window_bounds = array<i64: 2, 128>}, {pipeline_mode = #tpu.pipeline_mode<synchronous>, transform_indices = @transform_3, window_bounds = array<i64: 128, 128>}, {pipeline_mode = #tpu.pipeline_mode<synchronous>, transform_indices = @transform_4, window_bounds = array<i64: 1, 128>}, {transform_indices = @transform_5, window_bounds = array<i64: 8, 128>}]} {
    %c0 = arith.constant 0 : index
    %c0_0 = arith.constant 0 : index
    %0 = vector.load %arg1[%c0, %c0_0] : memref<8x32xbf16, #tpu.memory_space<vmem>>, vector<8x32xbf16>
    %c0_1 = arith.constant 0 : index
    %c0_2 = arith.constant 0 : index
    %1 = vector.load %arg2[%c0_1, %c0_2] : memref<32x128xbf16, #tpu.memory_space<vmem>>, vector<32x128xbf16>
    %cst = arith.constant dense<0.000000e+00> : vector<8x128xf32>
    %2 = tpu.matmul %0, %1, %cst {dimension_numbers = #tpu.dot_dimension_numbers<[1], [0], [0], [1], [0, 0, 1, 1], [], []>} : vector<8x32xbf16>, vector<32x128xbf16>, vector<8x128xf32> -> vector<8x128xf32>
    %c0_3 = arith.constant 0 : index
    %c0_4 = arith.constant 0 : index
    %3 = vector.load %arg3[%c0_3, %c0_4] : memref<2x128xf32, #tpu.memory_space<vmem>>, vector<1x128xf32>
    %4 = vector.broadcast %3 : vector<1x128xf32> to vector<8x128xf32>
    %5 = arith.mulf %2, %4 : vector<8x128xf32>
    %c1 = arith.constant 1 : index
    %c0_5 = arith.constant 0 : index
    %6 = vector.load %arg3[%c1, %c0_5] : memref<2x128xf32, #tpu.memory_space<vmem>>, vector<1x128xf32>
    %7 = vector.broadcast %6 : vector<1x128xf32> to vector<8x128xf32>
    %8 = arith.subf %5, %7 : vector<8x128xf32>
    %9 = arith.mulf %8, %8 : vector<8x128xf32>
    %cst_6 = arith.constant 1.000000e+00 : f32
    %10 = vector.broadcast %cst_6 : f32 to vector<8x128xf32>
    %11 = arith.subf %10, %9 : vector<8x128xf32>
    %cst_7 = arith.constant -5.000000e-01 : f32
    %12 = vector.broadcast %cst_7 : f32 to vector<8x128xf32>
    %13 = arith.mulf %12, %9 : vector<8x128xf32>
    %14 = math.exp %13 : vector<8x128xf32>
    %15 = arith.mulf %11, %14 : vector<8x128xf32>
    %16 = arith.truncf %15 : vector<8x128xf32> to vector<8x128xbf16>
    %c0_8 = arith.constant 0 : index
    %c0_9 = arith.constant 0 : index
    %17 = vector.load %arg4[%c0_8, %c0_9] : memref<128x128xbf16, #tpu.memory_space<vmem>>, vector<128x128xbf16>
    %cst_10 = arith.constant dense<0.000000e+00> : vector<8x128xf32>
    %18 = tpu.matmul %16, %17, %cst_10 {dimension_numbers = #tpu.dot_dimension_numbers<[1], [0], [0], [1], [0, 0, 1, 1], [], []>} : vector<8x128xbf16>, vector<128x128xbf16>, vector<8x128xf32> -> vector<8x128xf32>
    %c0_11 = arith.constant 0 : index
    %c0_12 = arith.constant 0 : index
    %19 = vector.load %arg5[%c0_11, %c0_12] : memref<1x128xf32, #tpu.memory_space<vmem>>, vector<1x128xf32>
    %20 = vector.broadcast %19 : vector<1x128xf32> to vector<8x128xf32>
    %21 = arith.addf %18, %20 : vector<8x128xf32>
    %c0_13 = arith.constant 0 : index
    %c0_14 = arith.constant 0 : index
    %22 = vector.load %arg6[%c0_13, %c0_14] : memref<8x128xf32, #tpu.memory_space<vmem>>, vector<8x128xf32>
    tpu.vector_store %arg6[%c0_13, %c0_14], %21 {strides = array<i32>} : memref<8x128xf32, #tpu.memory_space<vmem>>, vector<8x128xf32>,
    return
  }
  func.func @transform_0(%arg0: i32) -> (i32, i32) {
    %c0_i32 = arith.constant 0 : i32
    %c0_i32_0 = arith.constant 0 : i32
    return %arg0, %c0_i32 : i32, i32
  }
  func.func @transform_1(%arg0: i32) -> (i32, i32) {
    %c0_i32 = arith.constant 0 : i32
    %c0_i32_0 = arith.constant 0 : i32
    %c0_i32_1 = arith.constant 0 : i32
    return %c0_i32, %c0_i32_0 : i32, i32
  }
  func.func @transform_2(%arg0: i32) -> (i32, i32) {
    %c0_i32 = arith.constant 0 : i32
    %c0_i32_0 = arith.constant 0 : i32
    %c0_i32_1 = arith.constant 0 : i32
    return %c0_i32, %c0_i32_0 : i32, i32
  }
  func.func @transform_3(%arg0: i32) -> (i32, i32) {
    %c0_i32 = arith.constant 0 : i32
    %c0_i32_0 = arith.constant 0 : i32
    %c0_i32_1 = arith.constant 0 : i32
    return %c0_i32, %c0_i32_0 : i32, i32
  }
  func.func @transform_4(%arg0: i32) -> (i32, i32) {
    %c0_i32 = arith.constant 0 : i32
    %c0_i32_0 = arith.constant 0 : i32
    %c0_i32_1 = arith.constant 0 : i32
    return %c0_i32, %c0_i32_0 : i32, i32
  }
  func.func @transform_5(%arg0: i32) -> (i32, i32) {
    %c0_i32 = arith.constant 0 : i32
    %c0_i32_0 = arith.constant 0 : i32
    return %arg0, %c0_i32 : i32, i32
  }
}

</mosaic_0001>

<bundles_post_ra>
// kernel: wavelet_nn_forward.1
= control target key start
LH: loop header
LB: loop body
LE: loop exit
PB: predicated region body
PF: predicated region fallthrough
CT: control target
= control target key end

     0   :  { %10 = vsyncpa [#allocation3], 0  ;;  %s488_s0 = inlined_call_operand.vmem [shape: bf16[8,32], index: 0, kind: input, shape index: {}]   ;;  %s489_s1 = inlined_call_operand.hbm [shape: bf16[32,128], index: 1, kind: input, shape index: {}]   ;;  %s490_s2 = inlined_call_operand.vmem [shape: f32[2,128], index: 2, kind: input, shape index: {}]   ;;  %s491_s3 = inlined_call_operand.hbm [shape: bf16[128,128], index: 3, kind: input, shape index: {}]   ;;  %s492_s4 = inlined_call_operand.vmem [shape: f32[1,128], index: 4, kind: input, shape index: {}]   ;;  %s493_s5 = inlined_call_operand.hbm [shape: f32[8,128], index: 5, kind: output, shape index: {}]  }
   0x1   :  { %11 = vsyncpa [#allocation6], 0 }
   0x2   :  { %12 = vsyncpa [#allocation4], 0  ;;  %s403_s18 = smov [#allocation2]   ;;  %s331_s22 = scalar_lea.hbm %s489_s1, 256 }
   0x3   :  { %s20_s19 = sshll.u32 %s403_s18, 4  ;;  %p332_p0 = scmp.ne.s32.totalorder %s489_s1, %s331_s22  ;;  %s21_s19 = int_to_ptr.vmem [resolvable:$true] %s20_s19 }
   0x4   :  { %p335_p1 = scmp.lt.u32.totalorder %s331_s22, %s489_s1 }
   0x6   :  { %p337_p2 = pnand %p335_p1, %p332_p0 }
   0x8   :  { %340 = shalt.err (!%p337_p2)
}
   0x9   :  { %s341_s27 = scalar_lea.vmem %s21_s19, 256  ;;  %p346_p4 = scmp.lt.s32.totalorder %s21_s19, %s21_s19 }
   0xa   :  { %p342_p3 = scmp.ne.s32.totalorder %s21_s19, %s341_s27  ;;  %p347_p5 = scmp.lt.s32.totalorder %s341_s27, %s341_s27 }
   0xc   :  { %p348_p6 = por %p347_p5, %p346_p4 }
   0xe   :  { %p349_p7 = pnand %p348_p6, %p342_p3 }
  0x10   :  { %352 = shalt.err (!%p349_p7)
}
  0x11   :  { %s404_s28 = smov 64   ;;  %s405_s29 = smov 4  }
  0x12   :  { %26 = dma.hbm_to_vmem [thread:$0]  %s489_s1, 256, %s21_s19, [#allocation3], %s404_s28, %s404_s28, %s405_s29  }
  0x13   :  { %s406_s7 = smov [#allocation5]   ;;  %s353_s11 = scalar_lea.hbm %s491_s3, 1024 }
  0x14   :  { %s34_s8 = sshll.u32 %s406_s7, 4  ;;  %p354_p8 = scmp.ne.s32.totalorder %s491_s3, %s353_s11  ;;  %s35_s8 = int_to_ptr.vmem [resolvable:$true] %s34_s8 }
  0x15   :  { %p357_p9 = scmp.lt.u32.totalorder %s353_s11, %s491_s3 }
  0x17   :  { %p359_p10 = pnand %p357_p9, %p354_p8 }
  0x19   :  { %362 = shalt.err (!%p359_p10)
}
  0x1a   :  { %s363_s16 = scalar_lea.vmem %s35_s8, 1024  ;;  %p368_p12 = scmp.lt.s32.totalorder %s35_s8, %s35_s8 }
  0x1b   :  { %p364_p11 = scmp.ne.s32.totalorder %s35_s8, %s363_s16  ;;  %p369_p13 = scmp.lt.s32.totalorder %s363_s16, %s363_s16 }
  0x1d   :  { %p370_p0 = por %p369_p13, %p368_p12 }
  0x1f   :  { %p371_p1 = pnand %p370_p0, %p364_p11 }
  0x21   :  { %374 = shalt.err (!%p371_p1)
}
  0x22   :  { %40 = dma.hbm_to_vmem [thread:$0]  %s491_s3, 1024, %s35_s8, [#allocation6], %s404_s28, %s404_s28, %s405_s29  }
  0x23   :  { %397 = dma.done.wait [#allocation3], 256  }
  0x24   :  { %398 = vsyncadd [#allocation3], 4294967040 }
  0x25   :  { %399 = dma.done.wait [#allocation6], 1024  }
  0x26   :  { %400 = vsyncadd [#allocation6], 4294966272  ;;  %v407_v0 = vmov 0.0   ;;  %vm408_vm0 = vmmov 0   ;;  %v319_v1 = vld [vmem:[#allocation2] sm:$0xff]   ;;  %v320_v2 = vld [vmem:[#allocation2 + $0x8] sm:$0xff]  }
  0x27   :  { %284 = vmatprep.subr.bf16.mxu0 %v407_v0  ;;  %288 = vmatprep.mubr.msk.bf16.mxu0 %vm408_vm0, %v407_v0  ;;  %v321_v3 = vld [vmem:[#allocation5] sm:$0xff]   ;;  %v50_v4 = vld [vmem:[%s488_s0] sm:$0xf]  ;;  %vm67_vm1 = vcmask 261120   ;;  %v323_v6 = vld [vmem:[#allocation5 + $0x10] sm:$0xff]   ;;  %s409_s24 = smov [#allocation7]  }
  0x28   :  { %292 = vmatprep.subr.bf16.mxu1 %v407_v0  ;;  %308 = vmatprep.mubr.msk.bf16.mxu1 %vm408_vm0, %v407_v0  ;;  %v322_v5 = vld [vmem:[#allocation5 + $0x8] sm:$0xff]   ;;  %v324_v7 = vld [vmem:[#allocation5 + $0x18] sm:$0xff]   ;;  %v325_v8 = vld [vmem:[#allocation5 + $0x20] sm:$0xff]  }
  0x29   :  { %285 = vmatpush3.bf16.msra.mxu0 %v319_v1  ;;  %293 = vmatpush3.bf16.msra.mxu1 %v321_v3  ;;  %v326_v9 = vld [vmem:[#allocation5 + $0x28] sm:$0xff]   ;;  %v327_v10 = vld [vmem:[#allocation5 + $0x30] sm:$0xff]   ;;  %v328_v11 = vld [vmem:[#allocation5 + $0x38] sm:$0xff]  }
  0x2a   :  { %286 = vmatprep.subr.bf16.mxu0 %v407_v0  ;;  %294 = vmatprep.subr.bf16.mxu1 %v407_v0  ;;  %v261_v12 = vld [vmem:[%s490_s2] ss:$0 sm:$0xff]  ;;  %v262_v14 = vld [vmem:[%s490_s2 + $0x1] ss:$0 sm:$0xff]  ;;  %s248_s2 = sshll.u32 %s409_s24, 4  ;;  %s249_s2 = int_to_ptr.vmem [resolvable:$true] %s248_s2 }
  0x2b   :  { %v263_v27 = vld [vmem:[%s492_s4] ss:$0 sm:$0xff]  ;;  %s375_s25 = scalar_lea.vmem %s249_s2, 128  ;;  %p380_p3 = scmp.lt.s32.totalorder %s249_s2, %s249_s2 }
  0x2c   :  { %p376_p2 = scmp.ne.s32.totalorder %s249_s2, %s375_s25  ;;  %p381_p4 = scmp.lt.s32.totalorder %s375_s25, %s375_s25 }
  0x2d   :  { %287 = vmatpush3.bf16.msra.mxu0 %v320_v2  ;;  %295 = vmatpush3.bf16.msra.mxu1 %v322_v5 }
  0x2e   :  { %296 = vmatprep.subr.bf16.mxu1 %v407_v0  ;;  %p382_p5 = por %p381_p4, %p380_p3 }
  0x30   :  { %289 = vmatmul.mubr.msk.bf16.vlgmr.msra.gmra.mrb[0].mxu0 %vm67_vm1, %v50_v4  ;;  %p383_p6 = pnand %p382_p5, %p376_p2 }
  0x31   :  { %297 = vmatpush3.bf16.msra.mxu1 %v323_v6 }
  0x32   :  { %298 = vmatprep.subr.bf16.mxu1 %v407_v0 }
  0x35   :  { %299 = vmatpush3.bf16.msra.mxu1 %v324_v7 }
  0x36   :  { %300 = vmatprep.subr.bf16.mxu1 %v407_v0 }
  0x39   :  { %301 = vmatpush3.bf16.msra.mxu1 %v325_v8 }
  0x3a   :  { %302 = vmatprep.subr.bf16.mxu1 %v407_v0 }
  0x3d   :  { %303 = vmatpush3.bf16.msra.mxu1 %v326_v9 }
  0x3e   :  { %304 = vmatprep.subr.bf16.mxu1 %v407_v0 }
  0x41   :  { %305 = vmatpush3.bf16.msra.mxu1 %v327_v10 }
  0x42   :  { %306 = vmatprep.subr.bf16.mxu1 %v407_v0 }
  0x45   :  { %307 = vmatpush3.bf16.msra.mxu1 %v328_v11 }
 0x103   :  { %v105_v13 = vpop.f32.mrb[0].mxu0 }
 0x104   :  { %v116_v15 = vmul.f32 %v261_v12, %v105_v13  ;;  %v290_v16 = vpop.f32.mrb[1].mxu0 }
 0x105   :  { %v108_v17 = vpop.f32.mrb[2].mxu0 }
 0x106   :  { %v122_v18 = vsub.f32 %v116_v15, %v262_v14  ;;  %v291_v19 = vpop.f32.mrb[3].mxu0 }
 0x108   :  { %v123_v20 = vmul.f32 %v122_v18, %v122_v18 }
 0x10a   :  { %v125_v21 = vmul.f32 -0.5, %v123_v20  ;;  %v124_v23 = vsub.f32 1.0, %v123_v20 }
 0x10c   :  { %v126_v22 = vmul.f32 1.442695, %v125_v21 }
 0x10e   :  { %329 = vpow2.f32 %v126_v22 }
 0x118   :  { %v330_v24 = vpop.eup %329 }
 0x119   :  { %v128_v25 = vmul.f32 %v330_v24, %v124_v23 }
 0x11b   :  { %v129_v26 = vpack.c.bf16 %v128_v25, %v128_v25 }
 0x11d   :  { %309 = vmatmul.mubr.bf16.vlgmr.msra.gmra.mrb[0].mxu1 %v129_v26 }
 0x1f0   :  { %v235_v28 = vpop.f32.mrb[0].mxu1 }
 0x1f1   :  { %v236_v29 = vadd.f32 %v263_v27, %v235_v28  ;;  %v310_v30 = vpop.f32.mrb[1].mxu1 }
 0x1f2   :  { %v238_v31 = vpop.f32.mrb[2].mxu1 }
 0x1f3   :  { %241 = vst [vmem:[#allocation7] sm:$0xff] %v236_v29  ;;  %v311_v32 = vpop.f32.mrb[3].mxu1 }
 0x1f4   :  { %386 = shalt.err (!%p383_p6)
}
 0x1f5   :  { %s387_s4 = scalar_lea.hbm %s493_s5, 128 }
 0x1f6   :  { %p388_p7 = scmp.ne.s32.totalorder %s493_s5, %s387_s4  ;;  %p391_p8 = scmp.lt.u32.totalorder %s387_s4, %s493_s5 }
 0x1f8   :  { %p393_p9 = pnand %p391_p8, %p388_p7 }
 0x1fa   :  { %396 = shalt.err (!%p393_p9)
}
 0x1fb   :  { %251 = dma.vmem_to_hbm [thread:$0]  %s249_s2, 128, %s493_s5, [#allocation4]  }
 0x1fc   :  { %401 = dma.done.wait [#allocation4], 128  }
 0x1fd   :  { %402 = vsyncadd [#allocation4], 4294967168 }
 0x1fe   :  { %255 = vsyncpa [#allocation3], 1 }
 0x1ff   :  { %256 = vsyncpa [#allocation6], 1 }
 0x200   :  { %257 = vsyncpa [#allocation4], 1 }

</bundles_post_ra>
